<compile_context>
chip_gen: v6e
topology: v6e:2x2x1
jax: 0.10.0
libtpu: 0.0.40
codegen_flags: <defaults>
</compile_context>

<pallas_src>
import functools

import jax
import jax.numpy as jnp
from jax.experimental import pallas as pl
from jax.experimental.pallas import tpu as pltpu

_H1 = 128   # fc1 width
_H2 = 64    # fc2 width (pre-padding)
_HP = 128   # padded hidden / fused-head width
_NA = 4     # number of discrete actions


def _round_up(n, m):
    return ((n + m - 1) // m) * m


def _policy_kernel(x_ref, w1_ref, b1_ref, w2_ref, b2_ref, wh_ref, bh_ref, o_ref):
    # fc1 + ReLU (MXU, f32 accumulate; bias/activation in f32)
    h1 = jnp.dot(x_ref[...], w1_ref[...], preferred_element_type=jnp.float32)
    h1 = jnp.maximum(h1 + b1_ref[...], 0.0)                        # (TB, 128) f32

    # fc2 + ReLU; padded output cols 64:128 are exactly zero
    h2 = jnp.dot(h1.astype(w2_ref.dtype), w2_ref[...],
                 preferred_element_type=jnp.float32)
    h2 = jnp.maximum(h2 + b2_ref[...], 0.0)                        # (TB, 128) f32

    # fused heads: cols 0:3 action logits, col 4 bet logit, rest zero padding
    logits = jnp.dot(h2.astype(wh_ref.dtype), wh_ref[...],
                     preferred_element_type=jnp.float32) + bh_ref[...]

    lane = jax.lax.broadcasted_iota(jnp.int32, logits.shape, 1)

    # row-wise softmax over the 4 action lanes (padded lanes exp() -> 0)
    a_logits = jnp.where(lane < _NA, logits, -1e30)
    m = jnp.max(a_logits, axis=-1, keepdims=True)
    e = jnp.exp(a_logits - m)
    probs = e / jnp.sum(e, axis=-1, keepdims=True)

    # sigmoid bet head on lane 4 (manual logistic keeps it VPU/EUP friendly)
    sig = 1.0 / (1.0 + jnp.exp(-logits))
    bet = jnp.where(lane == _NA, sig, 0.0)

    o_ref[...] = (probs + bet).astype(o_ref.dtype)                 # (TB, 128)


def _prepare_params(params, d_in_padded, compute_dtype):
    """Pad / fuse the raw (in, out)-layout weights; all padding is exact."""
    w1, b1 = params["w1"], params["b1"]
    w2, b2 = params["w2"], params["b2"]
    wa, ba = params["wa"], params["ba"]
    wb, bb = params["wb"], params["bb"]
    d_in = w1.shape[0]

    # fc1: zero rows for padded input features
    w1p = jnp.zeros((d_in_padded, _H1), jnp.float32).at[:d_in, :].set(w1)
    b1p = b1.reshape(1, _H1)

    # fc2: zero cols / bias for padded hidden features (ReLU(0) == 0)
    w2p = jnp.zeros((_H1, _HP), jnp.float32).at[:, :_H2].set(w2)
    b2p = jnp.zeros((1, _HP), jnp.float32).at[:, :_H2].set(b2.reshape(1, _H2))

    # fused heads: action head in cols 0:4, bet head in col 4, zero elsewhere
    wh = (jnp.zeros((_HP, _HP), jnp.float32)
          .at[:_H2, :_NA].set(wa)
          .at[:_H2, _NA:_NA + 1].set(wb))
    bh = (jnp.zeros((1, _HP), jnp.float32)
          .at[:, :_NA].set(ba)
          .at[:, _NA].set(bb))

    return (w1p.astype(compute_dtype), b1p,
            w2p.astype(compute_dtype), b2p,
            wh.astype(compute_dtype), bh)


@functools.partial(jax.jit, static_argnames=("block_b", "use_bf16"))
def poker_policy_network(x, params, block_b=512, use_bf16=True):
    """x: (B, input_size) f32. Returns (action_probs (B,4), bet_size (B,1))."""
    B, d_in = x.shape
    d_in_p = max(_HP, _round_up(d_in, _HP))
    compute_dtype = jnp.bfloat16 if use_bf16 else jnp.float32

    w1p, b1p, w2p, b2p, wh, bh = _prepare_params(params, d_in_p, compute_dtype)

    xp = x if d_in_p == d_in else jnp.pad(x, ((0, 0), (0, d_in_p - d_in)))
    xp = xp.astype(compute_dtype)

    tb = min(block_b, _round_up(B, 8))
    grid = (pl.cdiv(B, tb),)
    const2d = lambda i: (0, 0)

    out = pl.pallas_call(
        _policy_kernel,
        out_shape=jax.ShapeDtypeStruct((B, _HP), jnp.float32),
        grid=grid,
        in_specs=[
            pl.BlockSpec((tb, d_in_p), lambda i: (i, 0)),   # x tile (pipelined)
            pl.BlockSpec((d_in_p, _H1), const2d),           # w1 (VMEM-resident)
            pl.BlockSpec((1, _H1), const2d),                # b1
            pl.BlockSpec((_H1, _HP), const2d),              # w2 (padded)
            pl.BlockSpec((1, _HP), const2d),                # b2 (padded)
            pl.BlockSpec((_HP, _HP), const2d),              # fused head weights
            pl.BlockSpec((1, _HP), const2d),                # fused head bias
        ],
        out_specs=pl.BlockSpec((tb, _HP), lambda i: (i, 0)),
        compiler_params=pltpu.CompilerParams(
            dimension_semantics=("parallel",),
            vmem_limit_bytes=32 << 20,
        ),
    )(xp, w1p, b1p, w2p, b2p, wh, bh)

    action_probs = out[:, :_NA]
    bet_size = out[:, _NA:_NA + 1]
    return action_probs, bet_size


def init_params(key, input_size):
    """nn.Linear-style init (U[-1/sqrt(fan_in), +]), stored as (in, out)."""
    ks = jax.random.split(key, 8)

    def lin(kw, kb, fan_in, fan_out):
        bound = 1.0 / (fan_in ** 0.5)
        w = jax.random.uniform(kw, (fan_in, fan_out), jnp.float32, -bound, bound)
        b = jax.random.uniform(kb, (fan_out,), jnp.float32, -bound, bound)
        return w, b

    w1, b1 = lin(ks[0], ks[1], input_size, _H1)
    w2, b2 = lin(ks[2], ks[3], _H1, _H2)
    wa, ba = lin(ks[4], ks[5], _H2, _NA)
    wb, bb = lin(ks[6], ks[7], _H2, 1)
    return {"w1": w1, "b1": b1, "w2": w2, "b2": b2,
            "wa": wa, "ba": ba, "wb": wb, "bb": bb}


def reference(x, p):
    h1 = jnp.maximum(x @ p["w1"] + p["b1"], 0.0)
    h2 = jnp.maximum(h1 @ p["w2"] + p["b2"], 0.0)
    probs = jax.nn.softmax(h2 @ p["wa"] + p["ba"], axis=-1)
    bet = jax.nn.sigmoid(h2 @ p["wb"] + p["bb"])
    return probs, bet


if __name__ == "__main__":
    key = jax.random.PRNGKey(0)
    k_x, k_p = jax.random.split(key)

    batch, input_size = 8, 32
    x = jax.random.normal(k_x, (batch, input_size), jnp.float32)
    params = init_params(k_p, input_size)

    ref_probs, ref_bet = reference(x, params)

    # f32 path: tight correctness check
    probs32, bet32 = jax.block_until_ready(
        poker_policy_network(x, params, use_bf16=False))
    assert probs32.shape == (batch, _NA), probs32.shape
    assert bet32.shape == (batch, 1), bet32.shape
    assert jnp.allclose(probs32, ref_probs, atol=1e-4, rtol=1e-4), "probs mismatch (f32)"
    assert jnp.allclose(bet32, ref_bet, atol=1e-4, rtol=1e-4), "bet mismatch (f32)"
    assert jnp.allclose(jnp.sum(probs32, axis=-1), 1.0, atol=1e-5), "probs not normalized"

    # bf16-operand perf path (f32 accumulate/activations): loose check
    probs16, bet16 = jax.block_until_ready(
        poker_policy_network(x, params, use_bf16=True))
    assert jnp.allclose(probs16, ref_probs, atol=3e-2, rtol=3e-2), "probs mismatch (bf16)"
    assert jnp.allclose(bet16, ref_bet, atol=3e-2, rtol=3e-2), "bet mismatch (bf16)"

    print("KERNEL_OK")
</pallas_src>

<mosaic_0001>
module attributes {stable_mosaic.version = 11 : i64} {
  func.func @_policy_kernel(%arg0: i32, %arg1: memref<8x128xf32, #tpu.memory_space<vmem>>, %arg2: memref<128x128xf32, #tpu.memory_space<vmem>>, %arg3: memref<1x128xf32, #tpu.memory_space<vmem>>, %arg4: memref<128x128xf32, #tpu.memory_space<vmem>>, %arg5: memref<1x128xf32, #tpu.memory_space<vmem>>, %arg6: memref<128x128xf32, #tpu.memory_space<vmem>>, %arg7: memref<1x128xf32, #tpu.memory_space<vmem>>, %arg8: memref<8x128xf32, #tpu.memory_space<vmem>>) attributes {dimension_semantics = [#tpu.dimension_semantics<parallel>], iteration_bounds = array<i64: 1>, scalar_prefetch = 0 : i64, scratch_operands = 0 : i64, tpu.core_type = #tpu.core_type<tc>, window_params = [{transform_indices = @transform_0, window_bounds = array<i64: 8, 128>}, {pipeline_mode = #tpu.pipeline_mode<synchronous>, transform_indices = @transform_1, window_bounds = array<i64: 128, 128>}, {pipeline_mode = #tpu.pipeline_mode<synchronous>, transform_indices = @transform_2, window_bounds = array<i64: 1, 128>}, {pipeline_mode = #tpu.pipeline_mode<synchronous>, transform_indices = @transform_3, window_bounds = array<i64: 128, 128>}, {pipeline_mode = #tpu.pipeline_mode<synchronous>, transform_indices = @transform_4, window_bounds = array<i64: 1, 128>}, {pipeline_mode = #tpu.pipeline_mode<synchronous>, transform_indices = @transform_5, window_bounds = array<i64: 128, 128>}, {pipeline_mode = #tpu.pipeline_mode<synchronous>, transform_indices = @transform_6, window_bounds = array<i64: 1, 128>}, {transform_indices = @transform_7, window_bounds = array<i64: 8, 128>}]} {
    %c0 = arith.constant 0 : index
    %c0_0 = arith.constant 0 : index
    %0 = vector.load %arg1[%c0, %c0_0] : memref<8x128xf32, #tpu.memory_space<vmem>>, vector<8x128xf32>
    %c0_1 = arith.constant 0 : index
    %c0_2 = arith.constant 0 : index
    %1 = vector.load %arg2[%c0_1, %c0_2] : memref<128x128xf32, #tpu.memory_space<vmem>>, vector<128x128xf32>
    %cst = arith.constant dense<0.000000e+00> : vector<8x128xf32>
    %2 = tpu.matmul %0, %1, %cst {dimension_numbers = #tpu.dot_dimension_numbers<[1], [0], [0], [1], [0, 0, 1, 1], [], []>} : vector<8x128xf32>, vector<128x128xf32>, vector<8x128xf32> -> vector<8x128xf32>
    %c0_3 = arith.constant 0 : index
    %c0_4 = arith.constant 0 : index
    %3 = vector.load %arg3[%c0_3, %c0_4] : memref<1x128xf32, #tpu.memory_space<vmem>>, vector<1x128xf32>
    %4 = vector.broadcast %3 : vector<1x128xf32> to vector<8x128xf32>
    %5 = arith.addf %2, %4 : vector<8x128xf32>
    %cst_5 = arith.constant 0.000000e+00 : f32
    %6 = vector.broadcast %cst_5 : f32 to vector<8x128xf32>
    %7 = arith.maximumf %5, %6 : vector<8x128xf32>
    %c0_6 = arith.constant 0 : index
    %c0_7 = arith.constant 0 : index
    %8 = vector.load %arg4[%c0_6, %c0_7] : memref<128x128xf32, #tpu.memory_space<vmem>>, vector<128x128xf32>
    %cst_8 = arith.constant dense<0.000000e+00> : vector<8x128xf32>
    %9 = tpu.matmul %7, %8, %cst_8 {dimension_numbers = #tpu.dot_dimension_numbers<[1], [0], [0], [1], [0, 0, 1, 1], [], []>} : vector<8x128xf32>, vector<128x128xf32>, vector<8x128xf32> -> vector<8x128xf32>
    %c0_9 = arith.constant 0 : index
    %c0_10 = arith.constant 0 : index
    %10 = vector.load %arg5[%c0_9, %c0_10] : memref<1x128xf32, #tpu.memory_space<vmem>>, vector<1x128xf32>
    %11 = vector.broadcast %10 : vector<1x128xf32> to vector<8x128xf32>
    %12 = arith.addf %9, %11 : vector<8x128xf32>
    %cst_11 = arith.constant 0.000000e+00 : f32
    %13 = vector.broadcast %cst_11 : f32 to vector<8x128xf32>
    %14 = arith.maximumf %12, %13 : vector<8x128xf32>
    %c0_12 = arith.constant 0 : index
    %c0_13 = arith.constant 0 : index
    %15 = vector.load %arg6[%c0_12, %c0_13] : memref<128x128xf32, #tpu.memory_space<vmem>>, vector<128x128xf32>
    %cst_14 = arith.constant dense<0.000000e+00> : vector<8x128xf32>
    %16 = tpu.matmul %14, %15, %cst_14 {dimension_numbers = #tpu.dot_dimension_numbers<[1], [0], [0], [1], [0, 0, 1, 1], [], []>} : vector<8x128xf32>, vector<128x128xf32>, vector<8x128xf32> -> vector<8x128xf32>
    %c0_15 = arith.constant 0 : index
    %c0_16 = arith.constant 0 : index
    %17 = vector.load %arg7[%c0_15, %c0_16] : memref<1x128xf32, #tpu.memory_space<vmem>>, vector<1x128xf32>
    %18 = vector.broadcast %17 : vector<1x128xf32> to vector<8x128xf32>
    %19 = arith.addf %16, %18 : vector<8x128xf32>
    %20 = tpu.iota {dimensions = array<i32: 1>} : vector<8x128xi32>
    %c4_i32 = arith.constant 4 : i32
    %21 = vector.broadcast %c4_i32 : i32 to vector<8x128xi32>
    %22 = arith.cmpi slt, %20, %21 : vector<8x128xi32>
    %cst_17 = arith.constant -1.000000e+30 : f32
    %23 = vector.broadcast %cst_17 : f32 to vector<8x128xf32>
    %24 = arith.select %22, %19, %23 : vector<8x128xi1>, vector<8x128xf32>
    %cst_18 = arith.constant dense<0xFF800000> : vector<8xf32>
    %25 = vector.multi_reduction <maximumf>, %24, %cst_18 [1] : vector<8x128xf32> to vector<8xf32>
    %26 = vector.shape_cast %25 : vector<8xf32> to vector<8x1xf32>
    %27 = vector.broadcast %26 : vector<8x1xf32> to vector<8x128xf32>
    %28 = arith.subf %24, %27 : vector<8x128xf32>
    %29 = math.exp %28 : vector<8x128xf32>
    %cst_19 = arith.constant dense<0.000000e+00> : vector<8xf32>
    %30 = vector.multi_reduction <add>, %29, %cst_19 [1] : vector<8x128xf32> to vector<8xf32>
    %31 = vector.shape_cast %30 : vector<8xf32> to vector<8x1xf32>
    %32 = vector.broadcast %31 : vector<8x1xf32> to vector<8x128xf32>
    %33 = arith.divf %29, %32 : vector<8x128xf32>
    %cst_20 = arith.constant 0.000000e+00 : f32
    %34 = vector.broadcast %cst_20 : f32 to vector<8x128xf32>
    %35 = arith.subf %34, %19 : vector<8x128xf32>
    %36 = math.exp %35 : vector<8x128xf32>
    %cst_21 = arith.constant 1.000000e+00 : f32
    %37 = vector.broadcast %cst_21 : f32 to vector<8x128xf32>
    %38 = arith.addf %37, %36 : vector<8x128xf32>
    %cst_22 = arith.constant 1.000000e+00 : f32
    %39 = vector.broadcast %cst_22 : f32 to vector<8x128xf32>
    %40 = arith.divf %39, %38 : vector<8x128xf32>
    %c4_i32_23 = arith.constant 4 : i32
    %41 = vector.broadcast %c4_i32_23 : i32 to vector<8x128xi32>
    %42 = arith.cmpi eq, %20, %41 : vector<8x128xi32>
    %cst_24 = arith.constant 0.000000e+00 : f32
    %43 = vector.broadcast %cst_24 : f32 to vector<8x128xf32>
    %44 = arith.select %42, %40, %43 : vector<8x128xi1>, vector<8x128xf32>
    %45 = arith.addf %33, %44 : vector<8x128xf32>
    %c0_25 = arith.constant 0 : index
    %c0_26 = arith.constant 0 : index
    %46 = vector.load %arg8[%c0_25, %c0_26] : memref<8x128xf32, #tpu.memory_space<vmem>>, vector<8x128xf32>
    tpu.vector_store %arg8[%c0_25, %c0_26], %45 {strides = array<i32>} : memref<8x128xf32, #tpu.memory_space<vmem>>, vector<8x128xf32>,
    return
  }
  func.func @transform_0(%arg0: i32) -> (i32, i32) {
    %c0_i32 = arith.constant 0 : i32
    %c0_i32_0 = arith.constant 0 : i32
    return %arg0, %c0_i32 : i32, i32
  }
  func.func @transform_1(%arg0: i32) -> (i32, i32) {
    %c0_i32 = arith.constant 0 : i32
    %c0_i32_0 = arith.constant 0 : i32
    %c0_i32_1 = arith.constant 0 : i32
    return %c0_i32, %c0_i32_0 : i32, i32
  }
  func.func @transform_2(%arg0: i32) -> (i32, i32) {
    %c0_i32 = arith.constant 0 : i32
    %c0_i32_0 = arith.constant 0 : i32
    %c0_i32_1 = arith.constant 0 : i32
    return %c0_i32, %c0_i32_0 : i32, i32
  }
  func.func @transform_3(%arg0: i32) -> (i32, i32) {
    %c0_i32 = arith.constant 0 : i32
    %c0_i32_0 = arith.constant 0 : i32
    %c0_i32_1 = arith.constant 0 : i32
    return %c0_i32, %c0_i32_0 : i32, i32
  }
  func.func @transform_4(%arg0: i32) -> (i32, i32) {
    %c0_i32 = arith.constant 0 : i32
    %c0_i32_0 = arith.constant 0 : i32
    %c0_i32_1 = arith.constant 0 : i32
    return %c0_i32, %c0_i32_0 : i32, i32
  }
  func.func @transform_5(%arg0: i32) -> (i32, i32) {
    %c0_i32 = arith.constant 0 : i32
    %c0_i32_0 = arith.constant 0 : i32
    %c0_i32_1 = arith.constant 0 : i32
    return %c0_i32, %c0_i32_0 : i32, i32
  }
  func.func @transform_6(%arg0: i32) -> (i32, i32) {
    %c0_i32 = arith.constant 0 : i32
    %c0_i32_0 = arith.constant 0 : i32
    %c0_i32_1 = arith.constant 0 : i32
    return %c0_i32, %c0_i32_0 : i32, i32
  }
  func.func @transform_7(%arg0: i32) -> (i32, i32) {
    %c0_i32 = arith.constant 0 : i32
    %c0_i32_0 = arith.constant 0 : i32
    return %arg0, %c0_i32 : i32, i32
  }
}

</mosaic_0001>

<bundles_post_ra>
// kernel: poker_policy_network.1
= control target key start
LH: loop header
LB: loop body
LE: loop exit
PB: predicated region body
PF: predicated region fallthrough
CT: control target
= control target key end

     0   :  { %v504_v0 = vmov 0.0   ;;  %vm505_vm0 = vmmov 0   ;;  %v308_v60 = vlaneseq  ;;  %s759_s1 = inlined_call_operand.vmem [shape: f32[128,128], index: 1, kind: input, shape index: {}]   ;;  %s760_s3 = inlined_call_operand.vmem [shape: f32[128,128], index: 3, kind: input, shape index: {}]   ;;  %s761_s0 = inlined_call_operand.vmem [shape: f32[8,128], index: 0, kind: input, shape index: {}]   ;;  %s762_s5 = inlined_call_operand.vmem [shape: f32[128,128], index: 5, kind: input, shape index: {}]   ;;  %s763_s2 = inlined_call_operand.vmem [shape: f32[1,128], index: 2, kind: input, shape index: {}]   ;;  %s764_s4 = inlined_call_operand.vmem [shape: f32[1,128], index: 4, kind: input, shape index: {}]   ;;  %s765_s6 = inlined_call_operand.vmem [shape: f32[1,128], index: 6, kind: input, shape index: {}]   ;;  %s766_s7 = inlined_call_operand.vmem [shape: f32[8,128], index: 7, kind: output, shape index: {}]  }
   0x1   :  { %389 = vmatprep.subr.mxu0 %v504_v0  ;;  %v42_v1 = vld [vmem:[%s759_s1 + $0x78] sm:$0xff]  ;;  %v41_v2 = vld [vmem:[%s759_s1 + $0x70] sm:$0xff]  ;;  %421 = vmatprep.mubr.msk.f32.mxu0 %vm505_vm0, %v504_v0  ;;  %v40_v3 = vld [vmem:[%s759_s1 + $0x68] sm:$0xff] }
   0x2   :  { %390 = vmatpush3.msra.mxu0 %v42_v1  ;;  %424 = vmatprep.subr.mxu1 %v504_v0  ;;  %v39_v4 = vld [vmem:[%s759_s1 + $0x60] sm:$0xff]  ;;  %v136_v5 = vld [vmem:[%s760_s3 + $0x78] sm:$0xff]  ;;  %v135_v7 = vld [vmem:[%s760_s3 + $0x70] sm:$0xff]  ;;  %v309_v61 = vand.u32 127, %v308_v60 }
   0x3   :  { %391 = vmatprep.subr.mxu0 %v504_v0  ;;  %456 = vmatprep.mubr.msk.f32.mxu1 %vm505_vm0, %v504_v0  ;;  %v38_v6 = vld [vmem:[%s759_s1 + $0x58] sm:$0xff]  ;;  %v134_v8 = vld [vmem:[%s760_s3 + $0x68] sm:$0xff]  ;;  %v37_v9 = vld [vmem:[%s759_s1 + $0x50] sm:$0xff] }
   0x4   :  { %392 = vmatpush3.msra.mxu0 %v41_v2  ;;  %425 = vmatpush3.msra.mxu1 %v136_v5  ;;  %v133_v10 = vld [vmem:[%s760_s3 + $0x60] sm:$0xff]  ;;  %v36_v11 = vld [vmem:[%s759_s1 + $0x48] sm:$0xff]  ;;  %v132_v12 = vld [vmem:[%s760_s3 + $0x58] sm:$0xff]  ;;  %vm310_vm1 = vcmp.lt.s32.totalorder %v309_v61, 4  ;;  %vm327_vm2 = vcmp.eq.s32.totalorder %v309_v61, 4 }
   0x5   :  { %393 = vmatprep.subr.mxu0 %v504_v0  ;;  %426 = vmatprep.subr.mxu1 %v504_v0  ;;  %v35_v13 = vld [vmem:[%s759_s1 + $0x40] sm:$0xff]  ;;  %v131_v14 = vld [vmem:[%s760_s3 + $0x50] sm:$0xff]  ;;  %v34_v15 = vld [vmem:[%s759_s1 + $0x38] sm:$0xff] }
   0x6   :  { %394 = vmatpush3.msra.mxu0 %v40_v3  ;;  %427 = vmatpush3.msra.mxu1 %v135_v7  ;;  %v130_v16 = vld [vmem:[%s760_s3 + $0x48] sm:$0xff]  ;;  %v33_v17 = vld [vmem:[%s759_s1 + $0x30] sm:$0xff]  ;;  %v129_v18 = vld [vmem:[%s760_s3 + $0x40] sm:$0xff] }
   0x7   :  { %395 = vmatprep.subr.mxu0 %v504_v0  ;;  %428 = vmatprep.subr.mxu1 %v504_v0  ;;  %v32_v19 = vld [vmem:[%s759_s1 + $0x28] sm:$0xff]  ;;  %v128_v20 = vld [vmem:[%s760_s3 + $0x38] sm:$0xff]  ;;  %v31_v21 = vld [vmem:[%s759_s1 + $0x20] sm:$0xff] }
   0x8   :  { %396 = vmatpush3.msra.mxu0 %v39_v4  ;;  %429 = vmatpush3.msra.mxu1 %v134_v8  ;;  %v127_v22 = vld [vmem:[%s760_s3 + $0x30] sm:$0xff]  ;;  %v30_v23 = vld [vmem:[%s759_s1 + $0x18] sm:$0xff]  ;;  %v126_v24 = vld [vmem:[%s760_s3 + $0x28] sm:$0xff] }
   0x9   :  { %397 = vmatprep.subr.mxu0 %v504_v0  ;;  %430 = vmatprep.subr.mxu1 %v504_v0  ;;  %v29_v25 = vld [vmem:[%s759_s1 + $0x10] sm:$0xff]  ;;  %v125_v26 = vld [vmem:[%s760_s3 + $0x20] sm:$0xff]  ;;  %v28_v27 = vld [vmem:[%s759_s1 + $0x8] sm:$0xff] }
   0xa   :  { %398 = vmatpush3.msra.mxu0 %v38_v6  ;;  %431 = vmatpush3.msra.mxu1 %v133_v10  ;;  %v124_v28 = vld [vmem:[%s760_s3 + $0x18] sm:$0xff]  ;;  %v27_v29 = vld [vmem:[%s759_s1] sm:$0xff]  ;;  %v123_v31 = vld [vmem:[%s760_s3 + $0x10] sm:$0xff] }
   0xb   :  { %399 = vmatprep.subr.mxu0 %v504_v0  ;;  %432 = vmatprep.subr.mxu1 %v504_v0  ;;  %v26_v30 = vld [vmem:[%s761_s0] sm:$0xff]  ;;  %v122_v32 = vld [vmem:[%s760_s3 + $0x8] sm:$0xff]  ;;  %v230_v34 = vld [vmem:[%s762_s5 + $0x78] sm:$0xff] }
   0xc   :  { %400 = vmatpush3.msra.mxu0 %v37_v9  ;;  %433 = vmatpush3.msra.mxu1 %v132_v12  ;;  %v121_v33 = vld [vmem:[%s760_s3] sm:$0xff]  ;;  %v229_v35 = vld [vmem:[%s762_s5 + $0x70] sm:$0xff]  ;;  %v228_v36 = vld [vmem:[%s762_s5 + $0x68] sm:$0xff] }
   0xd   :  { %401 = vmatprep.subr.mxu0 %v504_v0  ;;  %434 = vmatprep.subr.mxu1 %v504_v0  ;;  %v227_v37 = vld [vmem:[%s762_s5 + $0x60] sm:$0xff]  ;;  %v226_v38 = vld [vmem:[%s762_s5 + $0x58] sm:$0xff]  ;;  %v225_v39 = vld [vmem:[%s762_s5 + $0x50] sm:$0xff] }
   0xe   :  { %402 = vmatpush3.msra.mxu0 %v36_v11  ;;  %435 = vmatpush3.msra.mxu1 %v131_v14  ;;  %v224_v40 = vld [vmem:[%s762_s5 + $0x48] sm:$0xff]  ;;  %v223_v41 = vld [vmem:[%s762_s5 + $0x40] sm:$0xff]  ;;  %v222_v42 = vld [vmem:[%s762_s5 + $0x38] sm:$0xff] }
   0xf   :  { %403 = vmatprep.subr.mxu0 %v504_v0  ;;  %436 = vmatprep.subr.mxu1 %v504_v0  ;;  %v221_v43 = vld [vmem:[%s762_s5 + $0x30] sm:$0xff]  ;;  %v220_v44 = vld [vmem:[%s762_s5 + $0x28] sm:$0xff]  ;;  %v219_v45 = vld [vmem:[%s762_s5 + $0x20] sm:$0xff] }
  0x10   :  { %404 = vmatpush3.msra.mxu0 %v35_v13  ;;  %437 = vmatpush3.msra.mxu1 %v130_v16  ;;  %v218_v46 = vld [vmem:[%s762_s5 + $0x18] sm:$0xff]  ;;  %v335_v47 = vld [vmem:[%s763_s2] ss:$0 sm:$0xff]  ;;  %v217_v52 = vld [vmem:[%s762_s5 + $0x10] sm:$0xff] }
  0x11   :  { %405 = vmatprep.subr.mxu0 %v504_v0  ;;  %438 = vmatprep.subr.mxu1 %v504_v0  ;;  %v216_v53 = vld [vmem:[%s762_s5 + $0x8] sm:$0xff]  ;;  %v215_v54 = vld [vmem:[%s762_s5] sm:$0xff] }
  0x12   :  { %406 = vmatpush3.msra.mxu0 %v34_v15  ;;  %439 = vmatpush3.msra.mxu1 %v129_v18  ;;  %v336_v55 = vld [vmem:[%s764_s4] ss:$0 sm:$0xff] }
  0x13   :  { %407 = vmatprep.subr.mxu0 %v504_v0  ;;  %440 = vmatprep.subr.mxu1 %v504_v0  ;;  %v337_v62 = vld [vmem:[%s765_s6] ss:$0 sm:$0xff] }
  0x14   :  { %408 = vmatpush3.msra.mxu0 %v33_v17  ;;  %441 = vmatpush3.msra.mxu1 %v128_v20 }
  0x15   :  { %409 = vmatprep.subr.mxu0 %v504_v0  ;;  %442 = vmatprep.subr.mxu1 %v504_v0 }
  0x16   :  { %410 = vmatpush3.msra.mxu0 %v32_v19  ;;  %443 = vmatpush3.msra.mxu1 %v127_v22 }
  0x17   :  { %411 = vmatprep.subr.mxu0 %v504_v0  ;;  %444 = vmatprep.subr.mxu1 %v504_v0 }
  0x18   :  { %412 = vmatpush3.msra.mxu0 %v31_v21  ;;  %445 = vmatpush3.msra.mxu1 %v126_v24 }
  0x19   :  { %413 = vmatprep.subr.mxu0 %v504_v0  ;;  %446 = vmatprep.subr.mxu1 %v504_v0 }
  0x1a   :  { %414 = vmatpush3.msra.mxu0 %v30_v23  ;;  %447 = vmatpush3.msra.mxu1 %v125_v26 }
  0x1b   :  { %415 = vmatprep.subr.mxu0 %v504_v0  ;;  %448 = vmatprep.subr.mxu1 %v504_v0 }
  0x1c   :  { %416 = vmatpush3.msra.mxu0 %v29_v25  ;;  %449 = vmatpush3.msra.mxu1 %v124_v28 }
  0x1d   :  { %417 = vmatprep.subr.mxu0 %v504_v0  ;;  %450 = vmatprep.subr.mxu1 %v504_v0 }
  0x1e   :  { %418 = vmatpush3.msra.mxu0 %v28_v27  ;;  %451 = vmatpush3.msra.mxu1 %v123_v31 }
  0x1f   :  { %419 = vmatprep.subr.mxu0 %v504_v0  ;;  %452 = vmatprep.subr.mxu1 %v504_v0 }
  0x20   :  { %420 = vmatpush3.msra.mxu0 %v27_v29  ;;  %453 = vmatpush3.msra.mxu1 %v122_v32 }
  0x21   :  { %422 = vmatmul.mubr.f32.vlgmr.msra.gmra.mxu0 %v26_v30  ;;  %459 = vmatprep.subr.mxu0 %v504_v0 }
  0x22   :  { %491 = vmatprep.mubr.msk.f32.mxu0 %vm505_vm0, %v504_v0  ;;  %454 = vmatprep.subr.mxu1 %v504_v0 }
  0x23   :  { %455 = vmatpush3.msra.mxu1 %v121_v33  ;;  %460 = vmatpush3.msra.mxu0 %v230_v34 }
  0x24   :  { %461 = vmatprep.subr.mxu0 %v504_v0 }
  0x25   :  { %462 = vmatpush3.msra.mxu0 %v229_v35 }
  0x26   :  { %463 = vmatprep.subr.mxu0 %v504_v0 }
  0x27   :  { %464 = vmatpush3.msra.mxu0 %v228_v36 }
  0x28   :  { %465 = vmatprep.subr.mxu0 %v504_v0 }
  0x29   :  { %466 = vmatpush3.msra.mxu0 %v227_v37 }
  0x2a   :  { %467 = vmatprep.subr.mxu0 %v504_v0 }
  0x2b   :  { %468 = vmatpush3.msra.mxu0 %v226_v38 }
  0x2c   :  { %469 = vmatprep.subr.mxu0 %v504_v0 }
  0x2d   :  { %470 = vmatpush3.msra.mxu0 %v225_v39 }
  0x2e   :  { %471 = vmatprep.subr.mxu0 %v504_v0 }
  0x2f   :  { %472 = vmatpush3.msra.mxu0 %v224_v40 }
  0x30   :  { %473 = vmatprep.subr.mxu0 %v504_v0 }
  0x31   :  { %474 = vmatpush3.msra.mxu0 %v223_v41 }
  0x32   :  { %475 = vmatprep.subr.mxu0 %v504_v0 }
  0x33   :  { %476 = vmatpush3.msra.mxu0 %v222_v42 }
  0x34   :  { %477 = vmatprep.subr.mxu0 %v504_v0 }
  0x35   :  { %478 = vmatpush3.msra.mxu0 %v221_v43 }
  0x36   :  { %479 = vmatprep.subr.mxu0 %v504_v0 }
  0x37   :  { %480 = vmatpush3.msra.mxu0 %v220_v44 }
  0x38   :  { %481 = vmatprep.subr.mxu0 %v504_v0 }
  0x39   :  { %482 = vmatpush3.msra.mxu0 %v219_v45 }
  0x3a   :  { %483 = vmatprep.subr.mxu0 %v504_v0 }
  0x3b   :  { %484 = vmatpush3.msra.mxu0 %v218_v46 }
  0x3c   :  { %485 = vmatprep.subr.mxu0 %v504_v0 }
  0x3d   :  { %486 = vmatpush3.msra.mxu0 %v217_v52 }
  0x3e   :  { %487 = vmatprep.subr.mxu0 %v504_v0 }
  0x3f   :  { %488 = vmatpush3.msra.mxu0 %v216_v53 }
  0x40   :  { %489 = vmatprep.subr.mxu0 %v504_v0 }
  0x41   :  { %490 = vmatpush3.msra.mxu0 %v215_v54 }
  0xe1   :  { %v116_v48 = vpop.f32.mrf.mxu0 }
  0xe2   :  { %v117_v49 = vadd.f32 %v335_v47, %v116_v48 }
  0xe3   :  { %v423_v50 = vpop.f32.mrf.mxu0 }
  0xe4   :  { %v120_v51 = vmax.f32 %v117_v49, 0.0 }
  0xe6   :  { %457 = vmatmul.mubr.f32.vlgmr.msra.gmra.mxu1 %v120_v51 }
 0x1a6   :  { %v210_v56 = vpop.f32.mrf.mxu1 }
 0x1a7   :  { %v211_v57 = vadd.f32 %v336_v55, %v210_v56 }
 0x1a8   :  { %v458_v58 = vpop.f32.mrf.mxu1 }
 0x1a9   :  { %v214_v59 = vmax.f32 %v211_v57, 0.0 }
 0x1ab   :  { %492 = vmatmul.mubr.f32.vlgmr.msra.gmra.mxu0 %v214_v59 }
 0x26b   :  { %v304_v63 = vpop.f32.mrf.mxu0 }
 0x26c   :  { %v305_v0 = vadd.f32 %v337_v62, %v304_v63 }
 0x26d   :  { %v493_v1 = vpop.f32.mrf.mxu0 }
 0x26e   :  { %v321_v2 = vsub.f32 0.0, %v305_v0  ;;  %v311_v3 = vsel %vm310_vm1, %v305_v0, -1e+30 }
 0x26f   :  { %312 = vmax.xlane.f32.xlu0 %v311_v3 }
 0x270   :  { %v322_v4 = vmul.f32 1.442695, %v321_v2 }
 0x272   :  { %496 = vpow2.f32 %v322_v4 }
 0x27f   :  { %v497_v5 = vpop.eup %496 }
 0x280   :  { %v324_v6 = vadd.f32 1.0, %v497_v5 }
 0x282   :  { %498 = vrcp.f32 %v324_v6 }
 0x28f   :  { %v499_v7 = vpop.eup %498 }
 0x290   :  { %v328_v8 = vsel %vm327_vm2, %v499_v7, 0.0 }
 0x2f8   :  { %v313_v9 = vpop.xlane.xlu0 %312 }
 0x2f9   :  { %v314_v10 = vsub.f32 %v311_v3, %v313_v9 }
 0x2fb   :  { %v315_v11 = vmul.f32 1.442695, %v314_v10 }
 0x2fd   :  { %500 = vpow2.f32 %v315_v11 }
 0x30a   :  { %v501_v12 = vpop.eup %500 }
 0x30b   :  { %317 = vadd.xlane.f32.xlu0 %v501_v12 }
 0x394   :  { %v318_v13 = vpop.xlane.xlu0 %317 }
 0x395   :  { %502 = vrcp.f32 %v318_v13 }
 0x3a2   :  { %v503_v14 = vpop.eup %502 }
 0x3a3   :  { %v320_v15 = vmul.f32 %v503_v14, %v501_v12 }
 0x3a5   :  { %v329_v16 = vadd.f32 %v328_v8, %v320_v15 }
 0x3a7   :  { %330 = vst [vmem:[%s766_s7] sm:$0xff] %v329_v16 }

</bundles_post_ra>
